<compile_context>
chip_gen: v5e
topology: v5e:2x2
jax: 0.10.0
libtpu: 0.0.40
codegen_flags: <defaults>
</compile_context>

<pallas_src>
import math
from functools import partial

import jax
import jax.numpy as jnp
from jax import lax
from jax.experimental import pallas as pl
from jax.experimental.pallas import tpu as pltpu


_VMEM_LIMIT = 32 * 1024 * 1024  # safe scoped-VMEM cap on v5e/v6e/v7x


def _cparams(semantics):
    return pltpu.CompilerParams(dimension_semantics=semantics,
                                vmem_limit_bytes=_VMEM_LIMIT)


# --------------------------- tile-size selection ----------------------------

def _choose_lane_tile(F, pref):
    """Largest multiple of 128 <= pref that divides F; else the full extent."""
    if F % 128 != 0:
        return F
    t = min(int(pref), F)
    t -= t % 128
    while t >= 128 and F % t != 0:
        t -= 128
    return t if t >= 128 else F


def _choose_row_tile(R, pref=256):
    """Row tile that divides R (multiple of 8 when tiling); else full extent."""
    if R <= pref:
        return R
    t = min(int(pref), R)
    t -= t % 8
    while t >= 8 and R % t != 0:
        t -= 8
    return t if t >= 8 else R


def _lane_pref(num_inputs, rows, budget_bytes=8 * 1024 * 1024):
    per_lane = max(1, num_inputs * 2 * rows * 4)   # inputs x double-buffer x f32
    return max(512, min(8192, budget_bytes // per_lane))


# ----------------------------- Pallas kernels -------------------------------

def _fused_image_kernel(img_ref, nre_ref, bck_ref, rec_ref, rsf_ref, w_ref,
                        nll_ref, bcko_ref, mh_ref, ms_ref, bl_ref,
                        *, half_invvar, inv_feat):
    """One tiled pass over the flattened image rows.

    Per row (batch element) accumulates:
      nll   = 0.5/var * sum (noisy_recon - image)^2
      bck   = 0.5/var * sum (apc_bck     - image)^2
      mseH  = 1/F     * sum (recon       - image)^2
      mseS  = 1/F     * sum (recon_soft  - image)^2
      bl    =           sum  image * w            (baseline linear, VPU only)
    Outputs stay resident in VMEM across the reduction grid axis.
    """
    @pl.when(pl.program_id(1) == 0)
    def _():
        nll_ref[...] = jnp.zeros_like(nll_ref)
        bcko_ref[...] = jnp.zeros_like(bcko_ref)
        mh_ref[...] = jnp.zeros_like(mh_ref)
        ms_ref[...] = jnp.zeros_like(ms_ref)
        bl_ref[...] = jnp.zeros_like(bl_ref)

    img = img_ref[...].astype(jnp.float32)

    d = nre_ref[...].astype(jnp.float32) - img
    nll_ref[...] += half_invvar * jnp.sum(d * d, axis=1, keepdims=True)

    d = bck_ref[...].astype(jnp.float32) - img
    bcko_ref[...] += half_invvar * jnp.sum(d * d, axis=1, keepdims=True)

    d = rec_ref[...].astype(jnp.float32) - img
    mh_ref[...] += inv_feat * jnp.sum(d * d, axis=1, keepdims=True)

    d = rsf_ref[...].astype(jnp.float32) - img
    ms_ref[...] += inv_feat * jnp.sum(d * d, axis=1, keepdims=True)

    w = w_ref[...].astype(jnp.float32)                    # (1, TF) broadcast
    bl_ref[...] += jnp.sum(img * w, axis=1, keepdims=True)


def fused_image_reductions(image, noisy_recon, bck, recon, recon_soft,
                           w_row, half_invvar):
    """Fused per-batch reductions.  All inputs flattened to [B, F]."""
    B = image.shape[0]
    F = math.prod(image.shape[1:])
    inv_feat = 1.0 / float(F)

    flat = lambda x: x.reshape(B, F)
    img2, nre2 = flat(image), flat(noisy_recon)
    bck2, rec2, rsf2 = flat(bck), flat(recon), flat(recon_soft)
    w2 = w_row.reshape(1, F)

    TB = _choose_row_tile(B)
    TF = _choose_lane_tile(F, _lane_pref(5, TB))
    grid = (B // TB, F // TF)

    data_spec = pl.BlockSpec((TB, TF), lambda i, k: (i, k))
    w_spec = pl.BlockSpec((1, TF), lambda i, k: (0, k))
    out_spec = pl.BlockSpec((TB, 1), lambda i, k: (i, 0))

    outs = pl.pallas_call(
        partial(_fused_image_kernel,
                half_invvar=float(half_invvar), inv_feat=inv_feat),
        out_shape=tuple(jax.ShapeDtypeStruct((B, 1), jnp.float32)
                        for _ in range(5)),
        grid=grid,
        in_specs=[data_spec, data_spec, data_spec, data_spec, data_spec, w_spec],
        out_specs=(out_spec, out_spec, out_spec, out_spec, out_spec),
        compiler_params=_cparams(("parallel", "arbitrary")),
    )(img2, nre2, bck2, rec2, rsf2, w2)

    nll, reg_bck, mse_h, mse_s, bl = (o[:, 0] for o in outs)
    return nll, reg_bck, mse_h, mse_s, bl


def _row_pair_sum_kernel(a_ref, b_ref, oa_ref, ob_ref):
    @pl.when(pl.program_id(1) == 0)
    def _():
        oa_ref[...] = jnp.zeros_like(oa_ref)
        ob_ref[...] = jnp.zeros_like(ob_ref)
    oa_ref[...] += jnp.sum(a_ref[...].astype(jnp.float32), axis=1, keepdims=True)
    ob_ref[...] += jnp.sum(b_ref[...].astype(jnp.float32), axis=1, keepdims=True)


def row_pair_sums(a, b):
    """Per-row sums of two same-shaped [R, F] arrays in one tiled pass."""
    R, F = a.shape
    TR = _choose_row_tile(R)
    TF = _choose_lane_tile(F, _lane_pref(2, TR))
    grid = (R // TR, F // TF)

    in_spec = pl.BlockSpec((TR, TF), lambda i, k: (i, k))
    out_spec = pl.BlockSpec((TR, 1), lambda i, k: (i, 0))

    sa, sb = pl.pallas_call(
        _row_pair_sum_kernel,
        out_shape=(jax.ShapeDtypeStruct((R, 1), jnp.float32),
                   jax.ShapeDtypeStruct((R, 1), jnp.float32)),
        grid=grid,
        in_specs=[in_spec, in_spec],
        out_specs=(out_spec, out_spec),
        compiler_params=_cparams(("parallel", "arbitrary")),
    )(a, b)
    return sa[:, 0], sb[:, 0]


def _pair_overlap2_kernel(t_ref, p1_ref, p2_ref, m1_ref, m2_ref, npix_ref):
    """Overlap matrices of one true-mask block vs. two predicted-mask blocks.

    mat_k[n,i,j] += sum_p t[n,i,p] * p_k[n,j,p]  (MXU batched contraction)
    npix[n]      += sum t[n]
    The true mask tile is loaded once and reused for both predictions.
    """
    @pl.when(pl.program_id(1) == 0)
    def _():
        m1_ref[...] = jnp.zeros_like(m1_ref)
        m2_ref[...] = jnp.zeros_like(m2_ref)
        npix_ref[...] = jnp.zeros_like(npix_ref)
    t = t_ref[...].astype(jnp.float32)                    # (TN, K1, TP)
    m1_ref[...] += jnp.einsum('nip,njp->nij', t, p1_ref[...].astype(jnp.float32),
                              preferred_element_type=jnp.float32)
    m2_ref[...] += jnp.einsum('nip,njp->nij', t, p2_ref[...].astype(jnp.float32),
                              preferred_element_type=jnp.float32)
    npix_ref[...] += jnp.sum(t, axis=(1, 2), keepdims=True)


def pair_overlap2(t, p1, p2):
    """mat_k[n,i,j] = sum_p t[n,i,p]*p_k[n,j,p] (k=1,2) and npix[n]=sum t[n]."""
    N, K1, P = t.shape
    K2 = p1.shape[1]
    TN = _choose_row_tile(N, pref=32)
    TP = _choose_lane_tile(P, _lane_pref(3, TN * max(K1, K2)))
    grid = (N // TN, P // TP)

    t_spec = pl.BlockSpec((TN, K1, TP), lambda n, k: (n, 0, k))
    p_spec = pl.BlockSpec((TN, K2, TP), lambda n, k: (n, 0, k))
    mat_spec = pl.BlockSpec((TN, K1, K2), lambda n, k: (n, 0, 0))
    npix_spec = pl.BlockSpec((TN, 1, 1), lambda n, k: (n, 0, 0))

    mat1, mat2, npix = pl.pallas_call(
        _pair_overlap2_kernel,
        out_shape=(jax.ShapeDtypeStruct((N, K1, K2), jnp.float32),
                   jax.ShapeDtypeStruct((N, K1, K2), jnp.float32),
                   jax.ShapeDtypeStruct((N, 1, 1), jnp.float32)),
        grid=grid,
        in_specs=[t_spec, p_spec, p_spec],
        out_specs=(mat_spec, mat_spec, npix_spec),
        compiler_params=_cparams(("parallel", "arbitrary")),
    )(t, p1, p2)
    return mat1, mat2, npix[:, 0, 0]


# --------------------------- ARI from overlap mat ---------------------------

def _ari_from_overlap(mat, num_pixels):
    """ARI score given the precomputed [N,K1,K2] overlap matrix and npix[N]."""
    def comb2(x):
        x = x * (x - 1)
        if x.ndim > 1:
            x = x.sum(axis=tuple(range(1, x.ndim)))
        return x

    sum_row = mat.sum(1)
    sum_col = mat.sum(2)
    comb_mat = comb2(mat)
    comb_row = comb2(sum_row)
    comb_col = comb2(sum_col)
    comb_num = comb2(num_pixels)
    comb_num_safe = jnp.where(comb_num == 0, 1.0, comb_num)
    comb_prod = comb_row * comb_col / comb_num_safe
    comb_mean = 0.5 * (comb_row + comb_col)
    diff = comb_mean - comb_prod
    diff_safe = jnp.where(diff == 0, 1.0, diff)
    score = (comb_mat - comb_prod) / diff_safe
    invalid = (comb_num == 0) | (diff == 0)
    return jnp.where(invalid, jnp.ones_like(score), score)


# ------------------------------- Model (JAX) --------------------------------

class PallasModel:
    def __init__(self, config):
        self.normal_invvar = 1.0 / (config['normal_scale'] ** 2)
        self.normal_const = math.log(2 * math.pi / self.normal_invvar)
        self.bl_momentum = config['bl_momentum']
        self.seg_overlap = config['seg_overlap']
        self.without_oc = config['without_oc']
        # registered buffers (updated eagerly, outside jit)
        self.score_mean = jnp.zeros([], jnp.float32)
        self.score_var = jnp.zeros([], jnp.float32)
        # TODO(synk): Encoder / Decoder / NetworkBaseline are not defined in the
        # reference module; NetworkBaseline is replaced by a deterministic
        # single linear layer (fused into the Pallas image-reduction kernel),
        # encoder/decoder outputs are synthesized.
        feat = config['image_channels'] * config['image_size'] ** 2
        self.net_bl_w = ((jnp.arange(feat, dtype=jnp.float32) % 7) - 3.0) * 0.01
        self.net_bl_b = 0.1

    # ------------------------------------------------------------------ data
    @staticmethod
    def convert_data(data, num_views, deterministic_data, key):
        batch_size, data_views = data['image'].shape[:2]
        if deterministic_data:
            index = jnp.broadcast_to(jnp.arange(data_views)[None],
                                     (batch_size, data_views))
        else:
            noise = jax.random.uniform(key, (batch_size, data_views))
            index = jnp.argsort(noise, axis=1)
        index = index[:, :num_views] if num_views >= 0 else index[:, num_views:]

        def sel(val):
            idx = index.reshape(index.shape + (1,) * (val.ndim - 2))
            return jnp.take_along_axis(val, idx.astype(jnp.int32), axis=1)

        data = {k: sel(v) for k, v in data.items()}
        image = data['image'].astype(jnp.float32) / 255.0
        seg_idx = data['segment'].astype(jnp.int32)                   # [B,V,H,W]
        # TODO(synk): data-dependent class count (mirrors the reference's
        # segment_base.max()+1); forces a host sync and is only valid eagerly.
        n_seg = int(jnp.max(seg_idx)) + 1
        segment = jax.nn.one_hot(seg_idx, n_seg, axis=2,
                                 dtype=jnp.float32)[:, :, :, None]    # [B,V,K,1,H,W]
        overlap = (data['overlap'][:, :, None, None] > 1).astype(jnp.float32)
        return image, segment, overlap

    # ---------------------------------------------------------------- losses
    def compute_losses(self, results, fused):
        image = results['image']                       # [B,V,C,H,W]
        B, V = image.shape[:2]
        loss_nll, loss_reg_bck, _, _, bl_dot = fused

        baseline = bl_dot + V * self.net_bl_b          # sum over views of linear

        score = lax.stop_gradient(-loss_nll - baseline)
        if score.shape[0] > 1:
            sub_score_var = jnp.var(score, ddof=1)
        else:
            sub_score_var = jnp.zeros([], jnp.float32)
        sub_score_mean = jnp.mean(score)
        num_views = V
        sq_num_views = num_views ** 2
        self.score_mean = (self.bl_momentum * self.score_mean
                           + (1 - self.bl_momentum) * sub_score_mean / num_views)
        self.score_var = (self.bl_momentum * self.score_var
                          + (1 - self.bl_momentum) * sub_score_var / sq_num_views)
        score = (score - self.score_mean * num_views) / jnp.maximum(
            jnp.sqrt(self.score_var * sq_num_views), 1.0)

        sel_log_prob = results['sel_log_prob']
        loss_discrete = -score * sel_log_prob
        loss_baseline = -score * baseline
        loss_nll = (loss_nll
                    + loss_discrete - lax.stop_gradient(loss_discrete)
                    + loss_baseline - lax.stop_gradient(loss_baseline))

        # shp / sdw regularizers: per-(b,v,s) row sums in one tiled kernel,
        # tiny zeta weighting done on the (B, S-1) result (no wrapper transpose).
        shp_soft = results['shp_soft'][:, :, :-1]       # [B,V,S-1,H,W]
        zeta = results['zeta']                          # [B,S-1]
        S1 = shp_soft.shape[2]
        HW = shp_soft.shape[-2] * shp_soft.shape[-1]
        shp_rows = shp_soft.reshape(B * V * S1, HW)

        has_sdw = 'sdw' in results
        if has_sdw:
            sdw_rows = results['sdw'][:, :, :-1].reshape(B * V * S1, HW)
        else:
            sdw_rows = shp_rows
        shp_sums, sdw_sums = row_pair_sums(shp_rows, sdw_rows)

        per_bs_shp = shp_sums.reshape(B, V, S1).sum(1)          # (B, S-1)
        loss_reg_shp = jnp.sum(per_bs_shp * zeta, axis=1)

        losses = {'nll': loss_nll, 'reg_bck': loss_reg_bck, 'reg_shp': loss_reg_shp}
        if has_sdw:
            per_bs_sdw = sdw_sums.reshape(B, V, S1).sum(1)
            losses['reg_sdw'] = jnp.sum(per_bs_sdw * zeta, axis=1)
        losses.update({k: v for k, v in results.items()
                       if k.split('_')[0] in ['kld', 'reg']})
        return losses, loss_baseline

    # ------------------------------------------------------------------- ARI
    def _ari_group(self, mask_true, mask_hard, mask_soft):
        """ARI scores for one true-mask against hard+soft predictions.

        The single-view ("_s") and multi-view ("_m") variants share one Pallas
        overlap pass: mat_m[b] = sum_v mat_s[b, v]  (no transpose copies).
        """
        B, V, K1 = mask_true.shape[:3]
        K2 = mask_hard.shape[2]
        t = mask_true.reshape(B * V, K1, -1)

        def one_hot_pred(m):
            oh = jax.nn.one_hot(jnp.argmax(m, axis=2), K2, axis=2, dtype=m.dtype)
            return oh.reshape(B * V, K2, -1)

        mat_h, mat_s, npix = pair_overlap2(t, one_hot_pred(mask_hard),
                                           one_hot_pred(mask_soft))

        def scores(mat):
            ari_s = _ari_from_overlap(mat, npix).reshape(B, V).mean(1)
            mat_m = mat.reshape(B, V, K1, K2).sum(1)
            npix_m = npix.reshape(B, V).sum(1)
            ari_m = _ari_from_overlap(mat_m, npix_m)
            return ari_s, ari_m

        return scores(mat_h), scores(mat_s)

    # --------------------------------------------------------------- metrics
    def compute_metrics(self, results, loss_baseline, fused):
        segment = results['segment']
        overlap = results['overlap']

        segment_obj = segment[:, :, :-1]
        segment_all_sel = segment if self.seg_overlap else segment * (1 - overlap)
        segment_obj_sel = (segment_obj if self.seg_overlap
                           else segment_obj * (1 - overlap))
        mask_hard_all = results['mask']
        mask_soft_all = results['mask_soft']

        (ari_hard_all_s, ari_hard_all_m), (ari_soft_all_s, ari_soft_all_m) = \
            self._ari_group(segment_all_sel, mask_hard_all, mask_soft_all)
        (ari_hard_obj_s, ari_hard_obj_m), (ari_soft_obj_s, ari_soft_obj_m) = \
            self._ari_group(segment_obj_sel, mask_hard_all[:, :, :-1],
                            mask_soft_all[:, :, :-1])

        _, _, mse_hard, mse_soft, _ = fused              # from fused image pass

        so = segment_obj.reshape(segment_obj.shape[:-3] + (-1,))
        count_true = jnp.max(so, axis=-1)
        count_true = jnp.max(count_true, axis=-2).sum(-1)
        count_pred = results['pres'][:, :-1].sum(1)
        count_acc = (count_true == count_pred).astype(jnp.float32)

        return {'ari_hard_all_s': ari_hard_all_s, 'ari_hard_all_m': ari_hard_all_m,
                'ari_hard_obj_s': ari_hard_obj_s, 'ari_hard_obj_m': ari_hard_obj_m,
                'ari_soft_all_s': ari_soft_all_s, 'ari_soft_all_m': ari_soft_all_m,
                'ari_soft_obj_s': ari_soft_obj_s, 'ari_soft_obj_m': ari_soft_obj_m,
                'mse_hard': mse_hard, 'mse_soft': mse_soft,
                'count': count_acc, 'baseline': loss_baseline}

    # --------------------------------------------------------------- results
    @staticmethod
    def convert_results(results):
        disc_key_list = ['image', 'recon', 'noisy_recon', 'recon_soft', 'mask',
                         'mask_soft', 'apc', 'noisy_apc', 'bck_sdw', 'shp',
                         'shp_soft', 'sdw', 'pres']
        cont_key_list = ['view_latent', 'attr_obj_latent', 'attr_bck_latent',
                         'logits_pres', 'zeta', 'logits_zeta', 'log_ord', 'trs']
        full_key_list = disc_key_list + cont_key_list
        out = {k: v for k, v in results.items() if k in full_key_list}
        for k in list(out):
            if k in disc_key_list:
                out[k] = (jnp.clip(out[k], 0, 1) * 255).astype(jnp.uint8)
        return out

    # --------------------------------------------------------------- forward
    def forward(self, data, phase_param, loss_coef, deterministic_data=True,
                key=None):
        # TODO(synk): without_oc / infer_extra / compute_outputs_gen require the
        # undefined Encoder/Decoder sub-modules and are not implemented.
        num_views = phase_param['num_views']
        num_slots = phase_param['num_slots']
        image, segment, overlap = self.convert_data(data, num_views,
                                                    deterministic_data, key)
        results_enc_dec = synthesize_enc_dec_results(key, image, num_slots)
        results_raw = {'image': image, 'segment': segment, 'overlap': overlap,
                       **results_enc_dec}

        # Single fused Pallas pass over the image-sized tensors:
        # loss_nll, loss_reg_bck, mse_hard, mse_soft, baseline-linear.
        B, V = image.shape[:2]
        w_tiled = jnp.tile(self.net_bl_w, V)            # per-view weight, tiled
        fused = fused_image_reductions(
            image, results_raw['noisy_recon'], results_raw['apc'][:, :, -1],
            results_raw['recon'], results_raw['recon_soft'],
            w_tiled, 0.5 * self.normal_invvar)

        losses, loss_baseline = self.compute_losses(results_raw, fused)
        metrics = self.compute_metrics(results_raw, loss_baseline, fused)
        results = self.convert_results(results_raw)
        outputs = {'result': results, 'metric': metrics, 'loss': losses}
        return outputs, results_raw


def synthesize_enc_dec_results(key, image, num_slots):
    """Deterministic stand-ins for the (undefined) Encoder/Decoder outputs."""
    B, V, C, H, W = image.shape
    S = num_slots
    ks = jax.random.split(key, 12)
    u = lambda k, shape: jax.random.uniform(k, shape, dtype=jnp.float32)
    mask_logits = jax.random.normal(ks[0], (B, V, S, 1, H, W), dtype=jnp.float32)
    mask_soft = jax.nn.softmax(mask_logits, axis=2)
    mask = jax.nn.one_hot(jnp.argmax(mask_soft, axis=2), S, axis=2,
                          dtype=jnp.float32)
    return {
        'recon': u(ks[1], (B, V, C, H, W)),
        'noisy_recon': u(ks[2], (B, V, C, H, W)),
        'recon_soft': u(ks[3], (B, V, C, H, W)),
        'apc': u(ks[4], (B, V, S, C, H, W)),
        'shp_soft': u(ks[5], (B, V, S, H, W)),
        'sdw': u(ks[6], (B, V, S, H, W)),
        'mask': mask,
        'mask_soft': mask_soft,
        'zeta': u(ks[7], (B, S - 1)),
        'pres': u(ks[8], (B, S)),
        'sel_log_prob': jnp.log(u(ks[9], (B,)) * 0.9 + 0.1),
    }


if __name__ == "__main__":
    B, Vd, C, H, W = 2, 3, 3, 16, 16
    num_views, num_slots = 2, 5
    n_seg = 4
    key = jax.random.PRNGKey(0)
    ks = jax.random.split(key, 6)

    data = {
        'image': jax.random.randint(ks[0], (B, Vd, C, H, W), 0, 256,
                                    dtype=jnp.int32).astype(jnp.uint8),
        'segment': jax.random.randint(ks[1], (B, Vd, H, W), 0, n_seg,
                                      dtype=jnp.int32),
        'overlap': jax.random.randint(ks[2], (B, Vd, H, W), 0, 3,
                                      dtype=jnp.int32),
    }
    config = {'normal_scale': 0.2, 'bl_momentum': 0.8, 'seg_overlap': False,
              'without_oc': False, 'image_channels': C, 'image_size': H}
    phase_param = {'num_views': num_views, 'num_slots': num_slots}
    loss_coef = {'temp_pres': 1.0, 'temp_ord': 1.0, 'temp_shp': 1.0,
                 'noise_scale_1': 0.01, 'noise_scale_2': 0.01}

    model = PallasModel(config)
    outputs, _ = model.forward(data, phase_param, loss_coef,
                               deterministic_data=True, key=ks[3])

    for leaf in jax.tree_util.tree_leaves(outputs):
        jax.block_until_ready(leaf)
    jax.block_until_ready(model.score_mean)
    jax.block_until_ready(model.score_var)
    print("KERNEL_OK")
</pallas_src>

<mosaic_0001>
module attributes {stable_mosaic.version = 11 : i64} {
  func.func @_fused_image_kernel(%arg0: i32, %arg1: i32, %arg2: memref<2x1536xf32, #tpu.memory_space<vmem>>, %arg3: memref<2x1536xf32, #tpu.memory_space<vmem>>, %arg4: memref<2x1536xf32, #tpu.memory_space<vmem>>, %arg5: memref<2x1536xf32, #tpu.memory_space<vmem>>, %arg6: memref<2x1536xf32, #tpu.memory_space<vmem>>, %arg7: memref<1x1536xf32, #tpu.memory_space<vmem>>, %arg8: memref<2x1xf32, #tpu.memory_space<vmem>>, %arg9: memref<2x1xf32, #tpu.memory_space<vmem>>, %arg10: memref<2x1xf32, #tpu.memory_space<vmem>>, %arg11: memref<2x1xf32, #tpu.memory_space<vmem>>, %arg12: memref<2x1xf32, #tpu.memory_space<vmem>>) attributes {dimension_semantics = [#tpu.dimension_semantics<parallel>, #tpu.dimension_semantics<arbitrary>], iteration_bounds = array<i64: 1, 1>, scalar_prefetch = 0 : i64, scratch_operands = 0 : i64, tpu.core_type = #tpu.core_type<tc>, window_params = [{transform_indices = @transform_0, window_bounds = array<i64: 2, 1536>}, {transform_indices = @transform_1, window_bounds = array<i64: 2, 1536>}, {transform_indices = @transform_2, window_bounds = array<i64: 2, 1536>}, {transform_indices = @transform_3, window_bounds = array<i64: 2, 1536>}, {transform_indices = @transform_4, window_bounds = array<i64: 2, 1536>}, {transform_indices = @transform_5, window_bounds = array<i64: 1, 1536>}, {transform_indices = @transform_6, window_bounds = array<i64: 2, 1>}, {transform_indices = @transform_7, window_bounds = array<i64: 2, 1>}, {transform_indices = @transform_8, window_bounds = array<i64: 2, 1>}, {transform_indices = @transform_9, window_bounds = array<i64: 2, 1>}, {transform_indices = @transform_10, window_bounds = array<i64: 2, 1>}]} {
    %c0_i32 = arith.constant 0 : i32
    %0 = arith.cmpi eq, %arg1, %c0_i32 : i32
    %1 = arith.extui %0 : i1 to i32
    %c0_i32_0 = arith.constant 0 : i32
    %2 = arith.cmpi ne, %1, %c0_i32_0 : i32
    scf.if %2 {
      %cst_40 = arith.constant 0.000000e+00 : f32
      %52 = vector.broadcast %cst_40 : f32 to vector<2x1xf32>
      %c0_41 = arith.constant 0 : index
      %c0_42 = arith.constant 0 : index
      %53 = vector.load %arg8[%c0_41, %c0_42] : memref<2x1xf32, #tpu.memory_space<vmem>>, vector<2x1xf32>
      tpu.vector_store %arg8[%c0_41, %c0_42], %52 {strides = array<i32>} : memref<2x1xf32, #tpu.memory_space<vmem>>, vector<2x1xf32>,
      %cst_43 = arith.constant 0.000000e+00 : f32
      %54 = vector.broadcast %cst_43 : f32 to vector<2x1xf32>
      %c0_44 = arith.constant 0 : index
      %c0_45 = arith.constant 0 : index
      %55 = vector.load %arg9[%c0_44, %c0_45] : memref<2x1xf32, #tpu.memory_space<vmem>>, vector<2x1xf32>
      tpu.vector_store %arg9[%c0_44, %c0_45], %54 {strides = array<i32>} : memref<2x1xf32, #tpu.memory_space<vmem>>, vector<2x1xf32>,
      %cst_46 = arith.constant 0.000000e+00 : f32
      %56 = vector.broadcast %cst_46 : f32 to vector<2x1xf32>
      %c0_47 = arith.constant 0 : index
      %c0_48 = arith.constant 0 : index
      %57 = vector.load %arg10[%c0_47, %c0_48] : memref<2x1xf32, #tpu.memory_space<vmem>>, vector<2x1xf32>
      tpu.vector_store %arg10[%c0_47, %c0_48], %56 {strides = array<i32>} : memref<2x1xf32, #tpu.memory_space<vmem>>, vector<2x1xf32>,
      %cst_49 = arith.constant 0.000000e+00 : f32
      %58 = vector.broadcast %cst_49 : f32 to vector<2x1xf32>
      %c0_50 = arith.constant 0 : index
      %c0_51 = arith.constant 0 : index
      %59 = vector.load %arg11[%c0_50, %c0_51] : memref<2x1xf32, #tpu.memory_space<vmem>>, vector<2x1xf32>
      tpu.vector_store %arg11[%c0_50, %c0_51], %58 {strides = array<i32>} : memref<2x1xf32, #tpu.memory_space<vmem>>, vector<2x1xf32>,
      %cst_52 = arith.constant 0.000000e+00 : f32
      %60 = vector.broadcast %cst_52 : f32 to vector<2x1xf32>
      %c0_53 = arith.constant 0 : index
      %c0_54 = arith.constant 0 : index
      %61 = vector.load %arg12[%c0_53, %c0_54] : memref<2x1xf32, #tpu.memory_space<vmem>>, vector<2x1xf32>
      tpu.vector_store %arg12[%c0_53, %c0_54], %60 {strides = array<i32>} : memref<2x1xf32, #tpu.memory_space<vmem>>, vector<2x1xf32>,
    } else {
    }
    %c0 = arith.constant 0 : index
    %c0_1 = arith.constant 0 : index
    %3 = vector.load %arg2[%c0, %c0_1] : memref<2x1536xf32, #tpu.memory_space<vmem>>, vector<2x1536xf32>
    %c0_2 = arith.constant 0 : index
    %c0_3 = arith.constant 0 : index
    %4 = vector.load %arg3[%c0_2, %c0_3] : memref<2x1536xf32, #tpu.memory_space<vmem>>, vector<2x1536xf32>
    %5 = arith.subf %4, %3 : vector<2x1536xf32>
    %c0_4 = arith.constant 0 : index
    %c0_5 = arith.constant 0 : index
    %6 = vector.load %arg8[%c0_4, %c0_5] : memref<2x1xf32, #tpu.memory_space<vmem>>, vector<2x1xf32>
    %7 = arith.mulf %5, %5 : vector<2x1536xf32>
    %cst = arith.constant dense<0.000000e+00> : vector<2xf32>
    %8 = vector.multi_reduction <add>, %7, %cst [1] : vector<2x1536xf32> to vector<2xf32>
    %9 = vector.shape_cast %8 : vector<2xf32> to vector<2x1xf32>
    %cst_6 = arith.constant 1.250000e+01 : f32
    %10 = vector.broadcast %cst_6 : f32 to vector<2x1xf32>
    %11 = arith.mulf %10, %9 : vector<2x1xf32>
    %12 = arith.addf %6, %11 : vector<2x1xf32>
    %c0_7 = arith.constant 0 : index
    %c0_8 = arith.constant 0 : index
    %13 = vector.load %arg8[%c0_7, %c0_8] : memref<2x1xf32, #tpu.memory_space<vmem>>, vector<2x1xf32>
    tpu.vector_store %arg8[%c0_7, %c0_8], %12 {strides = array<i32>} : memref<2x1xf32, #tpu.memory_space<vmem>>, vector<2x1xf32>,
    %c0_9 = arith.constant 0 : index
    %c0_10 = arith.constant 0 : index
    %14 = vector.load %arg4[%c0_9, %c0_10] : memref<2x1536xf32, #tpu.memory_space<vmem>>, vector<2x1536xf32>
    %15 = arith.subf %14, %3 : vector<2x1536xf32>
    %c0_11 = arith.constant 0 : index
    %c0_12 = arith.constant 0 : index
    %16 = vector.load %arg9[%c0_11, %c0_12] : memref<2x1xf32, #tpu.memory_space<vmem>>, vector<2x1xf32>
    %17 = arith.mulf %15, %15 : vector<2x1536xf32>
    %cst_13 = arith.constant dense<0.000000e+00> : vector<2xf32>
    %18 = vector.multi_reduction <add>, %17, %cst_13 [1] : vector<2x1536xf32> to vector<2xf32>
    %19 = vector.shape_cast %18 : vector<2xf32> to vector<2x1xf32>
    %cst_14 = arith.constant 1.250000e+01 : f32
    %20 = vector.broadcast %cst_14 : f32 to vector<2x1xf32>
    %21 = arith.mulf %20, %19 : vector<2x1xf32>
    %22 = arith.addf %16, %21 : vector<2x1xf32>
    %c0_15 = arith.constant 0 : index
    %c0_16 = arith.constant 0 : index
    %23 = vector.load %arg9[%c0_15, %c0_16] : memref<2x1xf32, #tpu.memory_space<vmem>>, vector<2x1xf32>
    tpu.vector_store %arg9[%c0_15, %c0_16], %22 {strides = array<i32>} : memref<2x1xf32, #tpu.memory_space<vmem>>, vector<2x1xf32>,
    %c0_17 = arith.constant 0 : index
    %c0_18 = arith.constant 0 : index
    %24 = vector.load %arg5[%c0_17, %c0_18] : memref<2x1536xf32, #tpu.memory_space<vmem>>, vector<2x1536xf32>
    %25 = arith.subf %24, %3 : vector<2x1536xf32>
    %c0_19 = arith.constant 0 : index
    %c0_20 = arith.constant 0 : index
    %26 = vector.load %arg10[%c0_19, %c0_20] : memref<2x1xf32, #tpu.memory_space<vmem>>, vector<2x1xf32>
    %27 = arith.mulf %25, %25 : vector<2x1536xf32>
    %cst_21 = arith.constant dense<0.000000e+00> : vector<2xf32>
    %28 = vector.multi_reduction <add>, %27, %cst_21 [1] : vector<2x1536xf32> to vector<2xf32>
    %29 = vector.shape_cast %28 : vector<2xf32> to vector<2x1xf32>
    %cst_22 = arith.constant 6.51041686E-4 : f32
    %30 = vector.broadcast %cst_22 : f32 to vector<2x1xf32>
    %31 = arith.mulf %30, %29 : vector<2x1xf32>
    %32 = arith.addf %26, %31 : vector<2x1xf32>
    %c0_23 = arith.constant 0 : index
    %c0_24 = arith.constant 0 : index
    %33 = vector.load %arg10[%c0_23, %c0_24] : memref<2x1xf32, #tpu.memory_space<vmem>>, vector<2x1xf32>
    tpu.vector_store %arg10[%c0_23, %c0_24], %32 {strides = array<i32>} : memref<2x1xf32, #tpu.memory_space<vmem>>, vector<2x1xf32>,
    %c0_25 = arith.constant 0 : index
    %c0_26 = arith.constant 0 : index
    %34 = vector.load %arg6[%c0_25, %c0_26] : memref<2x1536xf32, #tpu.memory_space<vmem>>, vector<2x1536xf32>
    %35 = arith.subf %34, %3 : vector<2x1536xf32>
    %c0_27 = arith.constant 0 : index
    %c0_28 = arith.constant 0 : index
    %36 = vector.load %arg11[%c0_27, %c0_28] : memref<2x1xf32, #tpu.memory_space<vmem>>, vector<2x1xf32>
    %37 = arith.mulf %35, %35 : vector<2x1536xf32>
    %cst_29 = arith.constant dense<0.000000e+00> : vector<2xf32>
    %38 = vector.multi_reduction <add>, %37, %cst_29 [1] : vector<2x1536xf32> to vector<2xf32>
    %39 = vector.shape_cast %38 : vector<2xf32> to vector<2x1xf32>
    %cst_30 = arith.constant 6.51041686E-4 : f32
    %40 = vector.broadcast %cst_30 : f32 to vector<2x1xf32>
    %41 = arith.mulf %40, %39 : vector<2x1xf32>
    %42 = arith.addf %36, %41 : vector<2x1xf32>
    %c0_31 = arith.constant 0 : index
    %c0_32 = arith.constant 0 : index
    %43 = vector.load %arg11[%c0_31, %c0_32] : memref<2x1xf32, #tpu.memory_space<vmem>>, vector<2x1xf32>
    tpu.vector_store %arg11[%c0_31, %c0_32], %42 {strides = array<i32>} : memref<2x1xf32, #tpu.memory_space<vmem>>, vector<2x1xf32>,
    %c0_33 = arith.constant 0 : index
    %c0_34 = arith.constant 0 : index
    %44 = vector.load %arg7[%c0_33, %c0_34] : memref<1x1536xf32, #tpu.memory_space<vmem>>, vector<1x1536xf32>
    %c0_35 = arith.constant 0 : index
    %c0_36 = arith.constant 0 : index
    %45 = vector.load %arg12[%c0_35, %c0_36] : memref<2x1xf32, #tpu.memory_space<vmem>>, vector<2x1xf32>
    %46 = vector.broadcast %44 : vector<1x1536xf32> to vector<2x1536xf32>
    %47 = arith.mulf %3, %46 : vector<2x1536xf32>
    %cst_37 = arith.constant dense<0.000000e+00> : vector<2xf32>
    %48 = vector.multi_reduction <add>, %47, %cst_37 [1] : vector<2x1536xf32> to vector<2xf32>
    %49 = vector.shape_cast %48 : vector<2xf32> to vector<2x1xf32>
    %50 = arith.addf %45, %49 : vector<2x1xf32>
    %c0_38 = arith.constant 0 : index
    %c0_39 = arith.constant 0 : index
    %51 = vector.load %arg12[%c0_38, %c0_39] : memref<2x1xf32, #tpu.memory_space<vmem>>, vector<2x1xf32>
    tpu.vector_store %arg12[%c0_38, %c0_39], %50 {strides = array<i32>} : memref<2x1xf32, #tpu.memory_space<vmem>>, vector<2x1xf32>,
    return
  }
  func.func @transform_0(%arg0: i32, %arg1: i32) -> (i32, i32) {
    %c0_i32 = arith.constant 0 : i32
    return %arg0, %arg1 : i32, i32
  }
  func.func @transform_1(%arg0: i32, %arg1: i32) -> (i32, i32) {
    %c0_i32 = arith.constant 0 : i32
    return %arg0, %arg1 : i32, i32
  }
  func.func @transform_2(%arg0: i32, %arg1: i32) -> (i32, i32) {
    %c0_i32 = arith.constant 0 : i32
    return %arg0, %arg1 : i32, i32
  }
  func.func @transform_3(%arg0: i32, %arg1: i32) -> (i32, i32) {
    %c0_i32 = arith.constant 0 : i32
    return %arg0, %arg1 : i32, i32
  }
  func.func @transform_4(%arg0: i32, %arg1: i32) -> (i32, i32) {
    %c0_i32 = arith.constant 0 : i32
    return %arg0, %arg1 : i32, i32
  }
  func.func @transform_5(%arg0: i32, %arg1: i32) -> (i32, i32) {
    %c0_i32 = arith.constant 0 : i32
    %c0_i32_0 = arith.constant 0 : i32
    return %c0_i32, %arg1 : i32, i32
  }
  func.func @transform_6(%arg0: i32, %arg1: i32) -> (i32, i32) {
    %c0_i32 = arith.constant 0 : i32
    %c0_i32_0 = arith.constant 0 : i32
    return %arg0, %c0_i32 : i32, i32
  }
  func.func @transform_7(%arg0: i32, %arg1: i32) -> (i32, i32) {
    %c0_i32 = arith.constant 0 : i32
    %c0_i32_0 = arith.constant 0 : i32
    return %arg0, %c0_i32 : i32, i32
  }
  func.func @transform_8(%arg0: i32, %arg1: i32) -> (i32, i32) {
    %c0_i32 = arith.constant 0 : i32
    %c0_i32_0 = arith.constant 0 : i32
    return %arg0, %c0_i32 : i32, i32
  }
  func.func @transform_9(%arg0: i32, %arg1: i32) -> (i32, i32) {
    %c0_i32 = arith.constant 0 : i32
    %c0_i32_0 = arith.constant 0 : i32
    return %arg0, %c0_i32 : i32, i32
  }
  func.func @transform_10(%arg0: i32, %arg1: i32) -> (i32, i32) {
    %c0_i32 = arith.constant 0 : i32
    %c0_i32_0 = arith.constant 0 : i32
    return %arg0, %c0_i32 : i32, i32
  }
}

</mosaic_0001>

<bundles_post_ra>
// kernel: tpu_custom_call.1
= control target key start
LH: loop header
LB: loop body
LE: loop exit
PB: predicated region body
PF: predicated region fallthrough
CT: control target
= control target key end

     0   :  { %16 = vsyncpa [#allocation3], 0  ;;  %s1019_s0 = inlined_call_operand.hbm [shape: f32[2,1536], index: 0, kind: input, shape index: {}]   ;;  %s1020_s1 = inlined_call_operand.hbm [shape: f32[2,1536], index: 1, kind: input, shape index: {}]   ;;  %s1021_s2 = inlined_call_operand.hbm [shape: f32[2,1536], index: 2, kind: input, shape index: {}]   ;;  %s1022_s3 = inlined_call_operand.hbm [shape: f32[2,1536], index: 3, kind: input, shape index: {}]   ;;  %s1023_s4 = inlined_call_operand.hbm [shape: f32[2,1536], index: 4, kind: input, shape index: {}]   ;;  %s1024_s5 = inlined_call_operand.hbm [shape: f32[1,1536], index: 5, kind: input, shape index: {}]   ;;  %s1025_s6 = inlined_call_operand.vmem [shape: f32[2,1], index: 6, kind: output, shape index: {0}]   ;;  %s1026_s7 = inlined_call_operand.vmem [shape: f32[2,1], index: 7, kind: output, shape index: {1}]   ;;  %s1027_s8 = inlined_call_operand.vmem [shape: f32[2,1], index: 8, kind: output, shape index: {2}]   ;;  %s1028_s9 = inlined_call_operand.vmem [shape: f32[2,1], index: 9, kind: output, shape index: {3}]   ;;  %s1029_s10 = inlined_call_operand.vmem [shape: f32[2,1], index: 10, kind: output, shape index: {4}]  }
   0x1   :  { %17 = vsyncpa [#allocation5], 0 }
   0x2   :  { %18 = vsyncpa [#allocation8], 0  ;;  %s36_s15 = sshll.u32 %s1020_s1, 4  ;;  %s37_s15 = int_to_ptr.hbm [resolvable:$true] %s36_s15 }
   0x3   :  { %19 = vsyncpa [#allocation11], 0  ;;  %s685_s16 = smov [#allocation4]   ;;  %s58_s20 = sshll.u32 %s1022_s3, 4  ;;  %s59_s20 = int_to_ptr.hbm [resolvable:$true] %s58_s20 }
   0x4   :  { %s38_s17 = sshll.u32 %s685_s16, 4  ;;  %s686_s21 = smov [#allocation7]   ;;  %s39_s17 = int_to_ptr.vmem [resolvable:$true] %s38_s17 }
   0x5   :  { %41 = dma.hbm_to_vmem [thread:$0]  %s37_s15, 384, %s39_s17, [#allocation5]  }
   0x6   :  { %s60_s22 = sshll.u32 %s686_s21, 4  ;;  %s25_s25 = sshll.u32 %s1019_s0, 4  ;;  %s61_s22 = int_to_ptr.vmem [resolvable:$true] %s60_s22  ;;  %s26_s25 = int_to_ptr.hbm [resolvable:$true] %s25_s25 }
   0x7   :  { %63 = dma.hbm_to_vmem [thread:$0]  %s59_s20, 384, %s61_s22, [#allocation8]  }
   0x8   :  { %s47_s27 = sshll.u32 %s1021_s2, 4  ;;  %s687_s28 = smov [#allocation2]   ;;  %s48_s27 = int_to_ptr.hbm [resolvable:$true] %s47_s27 }
   0x9   :  { %s27_s29 = sshll.u32 %s687_s28, 4  ;;  %s688_s3 = smov [#allocation6]   ;;  %s28_s29 = int_to_ptr.vmem [resolvable:$true] %s27_s29 }
   0xa   :  { %30 = dma.hbm_to_vmem [thread:$0]  %s26_s25, 384, %s28_s29, [#allocation3]  }
   0xb   :  { %s49_s30 = sshll.u32 %s688_s3, 4  ;;  %s69_s13 = sshll.u32 %s1023_s4, 4  ;;  %s50_s30 = int_to_ptr.vmem [resolvable:$true] %s49_s30  ;;  %s70_s13 = int_to_ptr.hbm [resolvable:$true] %s69_s13 }
   0xc   :  { %52 = dma.hbm_to_vmem [thread:$0]  %s48_s27, 384, %s50_s30, [#allocation5]  }
   0xd   :  { %s80_s15 = sshll.u32 %s1024_s5, 4  ;;  %s689_s16 = smov [#allocation9]   ;;  %s81_s15 = int_to_ptr.hbm [resolvable:$true] %s80_s15 }
   0xe   :  { %s71_s2 = sshll.u32 %s689_s16, 4  ;;  %s690_s17 = smov [#allocation10]   ;;  %s72_s2 = int_to_ptr.vmem [resolvable:$true] %s71_s2 }
   0xf   :  { %74 = dma.hbm_to_vmem [thread:$0]  %s70_s13, 384, %s72_s2, [#allocation8]  }
  0x10   :  { %s82_s18 = sshll.u32 %s690_s17, 4  ;;  %s83_s18 = int_to_ptr.vmem [resolvable:$true] %s82_s18 }
  0x11   :  { %85 = dma.hbm_to_vmem [thread:$0]  %s81_s15, 192, %s83_s18, [#allocation11]  }
  0x12   :  { %677 = dma.done.wait [#allocation3], 384  }
  0x13   :  { %678 = vsyncadd [#allocation3], 4294966912 }
  0x14   :  { %679 = dma.done.wait [#allocation5], 768  }
  0x15   :  { %680 = vsyncadd [#allocation5], 4294966528 }
  0x16   :  { %681 = dma.done.wait [#allocation8], 768  }
  0x17   :  { %682 = vsyncadd [#allocation8], 4294966528 }
  0x18   :  { %683 = dma.done.wait [#allocation11], 192  }
  0x19   :  { %684 = vsyncadd [#allocation11], 4294967104  ;;  %v765_v0 = vld [vmem:[#allocation2] sm:$0xff]  ;;  %v767_v1 = vld [vmem:[#allocation2 + $0x8] sm:$0xff]  ;;  %vm164_vm0 = vcmask 1041408   ;;  %vm428_vm1 = vcmask 1045508  }
  0x1a   :  { %v123_v2 = vld [vmem:[#allocation4] sm:$0xff]  ;;  %v124_v3 = vld [vmem:[#allocation4 + $0x8] sm:$0xff]  ;;  %v771_v8 = vld [vmem:[#allocation2 + $0x10] sm:$0xff]  ;;  %vm430_vm2 = vcmask 1043456   ;;  %vm114_vm3 = vcmask 1024  }
  0x1b   :  { %v126_v4 = vsub.f32 %v123_v2, %v765_v0  ;;  %v127_v5 = vsub.f32 %v124_v3, %v767_v1  ;;  %v125_v9 = vld [vmem:[#allocation4 + $0x10] sm:$0xff]  ;;  %v195_v10 = vld [vmem:[#allocation6 + $0x8] sm:$0xff]  ;;  %v194_v16 = vld [vmem:[#allocation6] sm:$0xff] }
  0x1c   :  { %v128_v11 = vsub.f32 %v125_v9, %v771_v8  ;;  %v198_v12 = vsub.f32 %v195_v10, %v767_v1  ;;  %v197_v24 = vsub.f32 %v194_v16, %v765_v0  ;;  %v264_v25 = vld [vmem:[#allocation7 + $0x8] sm:$0xff]  ;;  %v196_v28 = vld [vmem:[#allocation6 + $0x10] sm:$0xff]  ;;  %v263_v40 = vld [vmem:[#allocation7] sm:$0xff] }
  0x1d   :  { %v130_v6 = vmul.f32 %v126_v4, %v126_v4  ;;  %v131_v7 = vmul.f32 %v127_v5, %v127_v5  ;;  %v267_v26 = vsub.f32 %v264_v25, %v767_v1  ;;  %v199_v35 = vsub.f32 %v196_v28, %v771_v8  ;;  %v265_v46 = vld [vmem:[#allocation7 + $0x10] sm:$0xff]  ;;  %v333_v47 = vld [vmem:[#allocation9 + $0x8] sm:$0xff]  ;;  %v334_v25 = vld [vmem:[#allocation9 + $0x10] sm:$0xff] }
  0x1e   :  { %v132_v13 = vmul.f32 %v128_v11, %v128_v11  ;;  %v202_v19 = vmul.f32 %v198_v12, %v198_v12  ;;  %v201_v27 = vmul.f32 %v197_v24, %v197_v24  ;;  %v266_v45 = vsub.f32 %v263_v40, %v765_v0  ;;  %v820_v54 = vld [vmem:[#allocation10] sm:$0xff]  ;;  %v332_v12 = vld [vmem:[#allocation9] sm:$0xff] }
  0x1f   :  { %136 = vst [vmem:[#allocation1] ss:$4 sm:$0xff] %v130_v6  ;;  %v271_v33 = vmul.f32 %v267_v26, %v267_v26  ;;  %v203_v39 = vmul.f32 %v199_v35, %v199_v35  ;;  %v336_v52 = vsub.f32 %v333_v47, %v767_v1  ;;  %v268_v57 = vsub.f32 %v265_v46, %v771_v8 }
  0x20   :  { %138 = vst [vmem:[#allocation1 + $0x20] ss:$4 sm:$0xff] %v131_v7  ;;  %v270_v48 = vmul.f32 %v266_v45, %v266_v45  ;;  %v410_v61 = vperm.slane %v820_v54, 4  ;;  %v411_v62 = vperm.slane %v820_v54, 5  ;;  %v412_v63 = vperm.slane %v820_v54, 6 }
  0x21   :  { %v340_v58 = vmul.f32 %v336_v52, %v336_v52  ;;  %v413_v2 = vperm.slane %v820_v54, 7  ;;  %v272_v3 = vmul.f32 %v268_v57, %v268_v57  ;;  %v407_v26 = vperm.slane %v820_v54, 1 }
  0x22   :  { %v421_v4 = vrot.slane %v411_v62, 6  ;;  %v422_v7 = vrot.slane %v412_v63, 4  ;;  %v335_v40 = vsub.f32 %v332_v12, %v765_v0 }
  0x23   :  { %v423_v9 = vrot.slane %v413_v2, 2  ;;  %v409_v2 = vperm.slane %v820_v54, 3 }
  0x24   :  { %v339_v57 = vmul.f32 %v335_v40, %v335_v40 }
  0x25   :  { %v433_v16 = vsel %vm428_vm1, %v422_v7, %v423_v9 }
  0x26   :  { %v775_v14 = vld.sshfl [vmem:[#allocation1] sm:$0xff pattern:$0x73625140]  ;;  %v777_v15 = vld.sshfl [vmem:[#allocation1 + $0x8] sm:$0xff pattern:$0x73625140] }
  0x27   :  { %v779_v17 = vld.sshfl [vmem:[#allocation1 + $0x10] sm:$0xff pattern:$0x73625140]  ;;  %v781_v18 = vld.sshfl [vmem:[#allocation1 + $0x18] sm:$0xff pattern:$0x73625140] }
  0x28   :  { %v783_v20 = vld.sshfl [vmem:[#allocation1 + $0x20] sm:$0xff pattern:$0x73625140]  ;;  %v785_v21 = vld.sshfl [vmem:[#allocation1 + $0x28] sm:$0xff pattern:$0x73625140] }
  0x29   :  { %v787_v22 = vld.sshfl [vmem:[#allocation1 + $0x30] sm:$0xff pattern:$0x73625140]  ;;  %v789_v23 = vld.sshfl [vmem:[#allocation1 + $0x38] sm:$0xff pattern:$0x73625140] }
  0x2a   :  { %147 = vst [vmem:[#allocation1] ss:$4 sm:$0xff] %v132_v13  ;;  %v432_v13 = vsel %vm164_vm0, %v410_v61, %v421_v4  ;;  %v166_v24 = vsel %vm164_vm0, %v777_v15, 0.0  ;;  %v172_v52 = vsel %vm164_vm0, %v783_v20, 0.0  ;;  %v406_v20 = vperm.slane %v820_v54, 0 }
  0x2b   :  { %209 = vst [vmem:[#allocation1 + $0x20] ss:$4 sm:$0xff] %v202_v19  ;;  %v165_v19 = vsel %vm164_vm0, %v775_v14, 0.0  ;;  %v418_v4 = vrot.slane %v407_v26, 6  ;;  %v176_v9 = vsel %vm164_vm0, %v787_v22, 0.0 }
  0x2c   :  { %v167_v28 = vadd.f32 %v166_v24, %v165_v19  ;;  %v887_v24 = vld [vmem:[#allocation10 + $0x8] sm:$0xf] }
  0x31   :  { %v793_v29 = vld.sshfl [vmem:[#allocation1] sm:$0xff pattern:$0x73625140]  ;;  %v795_v30 = vld.sshfl [vmem:[#allocation1 + $0x8] sm:$0xff pattern:$0x73625140] }
  0x32   :  { %v797_v31 = vld.sshfl [vmem:[#allocation1 + $0x10] sm:$0xff pattern:$0x73625140]  ;;  %v799_v32 = vld.sshfl [vmem:[#allocation1 + $0x18] sm:$0xff pattern:$0x73625140] }
  0x33   :  { %207 = vst [vmem:[#allocation1] ss:$4 sm:$0xff] %v201_v27  ;;  %v801_v34 = vld.sshfl [vmem:[#allocation1 + $0x20] sm:$0xff pattern:$0x73625140]  ;;  %v434_v27 = vsel %vm430_vm2, %v432_v13, %v433_v16  ;;  %v178_v16 = vsel %vm164_vm0, %v789_v23, 0.0 }
  0x34   :  { %v804_v36 = vld.sshfl [vmem:[#allocation1 + $0x28] sm:$0xff pattern:$0x73625140]  ;;  %v806_v37 = vld.sshfl [vmem:[#allocation1 + $0x30] sm:$0xff pattern:$0x73625140] }
  0x35   :  { %v808_v38 = vld.sshfl [vmem:[#allocation1 + $0x38] sm:$0xff pattern:$0x73625140] }
  0x36   :  { %278 = vst [vmem:[#allocation1 + $0x20] ss:$4 sm:$0xff] %v271_v33  ;;  %v168_v33 = vsel %vm164_vm0, %v779_v17, 0.0  ;;  %v170_v17 = vsel %vm164_vm0, %v781_v18, 0.0 }
  0x37   :  { %v169_v47 = vadd.f32 %v168_v33, %v167_v28 }
  0x3a   :  { %v810_v41 = vld.sshfl [vmem:[#allocation1] sm:$0xff pattern:$0x73625140]  ;;  %v812_v42 = vld.sshfl [vmem:[#allocation1 + $0x8] sm:$0xff pattern:$0x73625140] }
  0x3b   :  { %v814_v43 = vld.sshfl [vmem:[#allocation1 + $0x10] sm:$0xff pattern:$0x73625140]  ;;  %v816_v44 = vld.sshfl [vmem:[#allocation1 + $0x18] sm:$0xff pattern:$0x73625140] }
  0x3c   :  { %218 = vst [vmem:[#allocation1] ss:$4 sm:$0xff] %v203_v39  ;;  %v235_v19 = vsel %vm164_vm0, %v810_v41, 0.0  ;;  %v238_v22 = vsel %vm164_vm0, %v814_v43, 0.0  ;;  %v240_v26 = vsel %vm164_vm0, %v816_v44, 0.0  ;;  %v415_v43 = vperm.slane %v887_v24, 1 }
  0x3d   :  { %v283_v49 = vld.sshfl [vmem:[#allocation1 + $0x20] sm:$0xff pattern:$0x73625140]  ;;  %v284_v50 = vld.sshfl [vmem:[#allocation1 + $0x28] sm:$0xff pattern:$0x73625140] }
  0x3e   :  { %v285_v51 = vld.sshfl [vmem:[#allocation1 + $0x30] sm:$0xff pattern:$0x73625140]  ;;  %v286_v53 = vld.sshfl [vmem:[#allocation1 + $0x38] sm:$0xff pattern:$0x73625140] }
  0x3f   :  { %347 = vst [vmem:[#allocation1 + $0x20] ss:$4 sm:$0xff] %v340_v58  ;;  %v311_v5 = vsel %vm164_vm0, %v283_v49, 0.0  ;;  %v837_v6 = vsel %vm164_vm0, %v284_v50, 0.0  ;;  %v840_v10 = vsel %vm164_vm0, %v285_v51, 0.0  ;;  %v843_v11 = vsel %vm164_vm0, %v286_v53, 0.0 }
  0x40   :  { %v442_v49 = vmul.f32 %v434_v27, %v767_v1  ;;  %v337_v53 = vsub.f32 %v334_v25, %v771_v8  ;;  %v171_v58 = vadd.f32 %v170_v17, %v169_v47  ;;  %v408_v1 = vperm.slane %v820_v54, 2 }
  0x41   :  { %v180_v47 = vsel %vm164_vm0, %v793_v29, 0.0  ;;  %v417_v29 = vperm.slane %v887_v24, 3 }
  0x42   :  { %v173_v7 = vadd.f32 %v172_v52, %v171_v58 }
  0x43   :  { %v822_v55 = vld.sshfl [vmem:[#allocation1] sm:$0xff pattern:$0x73625140]  ;;  %v824_v56 = vld.sshfl [vmem:[#allocation1 + $0x8] sm:$0xff pattern:$0x73625140] }
  0x44   :  { %v827_v59 = vld.sshfl [vmem:[#allocation1 + $0x10] sm:$0xff pattern:$0x73625140]  ;;  %v829_v60 = vld.sshfl [vmem:[#allocation1 + $0x18] sm:$0xff pattern:$0x73625140] }
  0x45   :  { %276 = vst [vmem:[#allocation1] ss:$4 sm:$0xff] %v270_v48 }
  0x46   :  { %v866_v61 = vld.sshfl [vmem:[#allocation1 + $0x20] sm:$0xff pattern:$0x73625140]  ;;  %v868_v62 = vld.sshfl [vmem:[#allocation1 + $0x28] sm:$0xff pattern:$0x73625140] }
  0x47   :  { %v874_v18 = vld.sshfl [vmem:[#allocation1 + $0x30] sm:$0xff pattern:$0x73625140]  ;;  %v879_v12 = vld.sshfl [vmem:[#allocation1 + $0x38] sm:$0xff pattern:$0x73625140] }
  0x48   :  { %449 = vst [vmem:[#allocation1 + $0x20] ss:$4 sm:$0xff] %v442_v49  ;;  %v244_v49 = vsel %vm164_vm0, %v804_v36, 0.0 }
  0x4c   :  { %v279_v35 = vld.sshfl [vmem:[#allocation1] sm:$0xff pattern:$0x73625140]  ;;  %v280_v39 = vld.sshfl [vmem:[#allocation1 + $0x8] sm:$0xff pattern:$0x73625140] }
  0x4d   :  { %v281_v45 = vld.sshfl [vmem:[#allocation1 + $0x10] sm:$0xff pattern:$0x73625140]  ;;  %v282_v46 = vld.sshfl [vmem:[#allocation1 + $0x18] sm:$0xff pattern:$0x73625140] }
  0x4e   :  { %287 = vst [vmem:[#allocation1] ss:$4 sm:$0xff] %v272_v3  ;;  %v304_v14 = vsel %vm164_vm0, %v279_v35, 0.0  ;;  %v305_v15 = vsel %vm164_vm0, %v280_v39, 0.0  ;;  %v307_v48 = vsel %vm164_vm0, %v281_v45, 0.0  ;;  %v309_v51 = vsel %vm164_vm0, %v282_v46, 0.0 }
  0x4f   :  { %v306_v50 = vadd.f32 %v305_v15, %v304_v14  ;;  %v174_v3 = vsel %vm164_vm0, %v785_v21, 0.0  ;;  %v236_v21 = vsel %vm164_vm0, %v812_v42, 0.0  ;;  %v341_v39 = vmul.f32 %v337_v53, %v337_v53 }
  0x50   :  { %v175_v54 = vadd.f32 %v174_v3, %v173_v7  ;;  %v237_v25 = vadd.f32 %v236_v21, %v235_v19  ;;  %v419_v45 = vrot.slane %v408_v1, 4  ;;  %v420_v46 = vrot.slane %v409_v2, 2 }
  0x51   :  { %v308_v63 = vadd.f32 %v307_v48, %v306_v50  ;;  %v416_v48 = vperm.slane %v887_v24, 2 }
  0x52   :  { %v177_v41 = vadd.f32 %v176_v9, %v175_v54  ;;  %v239_v40 = vadd.f32 %v238_v22, %v237_v25  ;;  %v427_v9 = vsel %vm164_vm0, %v406_v20, %v418_v4  ;;  %v252_v4 = vsel %vm164_vm0, %v824_v56, 0.0 }
  0x53   :  { %v310_v13 = vadd.f32 %v309_v51, %v308_v63  ;;  %v382_v56 = vsel %vm164_vm0, %v868_v62, 0.0  ;;  %v386_v62 = vsel %vm164_vm0, %v879_v12, 0.0 }
  0x54   :  { %v179_v14 = vadd.f32 %v178_v16, %v177_v41  ;;  %v241_v44 = vadd.f32 %v240_v26, %v239_v40  ;;  %v425_v41 = vrot.slane %v416_v48, 4  ;;  %v426_v40 = vrot.slane %v417_v29, 2 }
  0x55   :  { %v288_v27 = vld.sshfl [vmem:[#allocation1] sm:$0xff pattern:$0x73625140]  ;;  %v289_v28 = vld.sshfl [vmem:[#allocation1 + $0x8] sm:$0xff pattern:$0x73625140]  ;;  %v312_v23 = vadd.f32 %v311_v5, %v310_v13  ;;  %v429_v13 = vsel %vm428_vm1, %v419_v45, %v420_v46 }
  0x56   :  { %v290_v33 = vld.sshfl [vmem:[#allocation1 + $0x10] sm:$0xff pattern:$0x73625140]  ;;  %v291_v35 = vld.sshfl [vmem:[#allocation1 + $0x18] sm:$0xff pattern:$0x73625140]  ;;  %v181_v51 = vadd.f32 %v180_v47, %v179_v14 }
  0x57   :  { %v314_v42 = vadd.f32 %v837_v6, %v312_v23  ;;  %345 = vst [vmem:[#allocation1] ss:$4 sm:$0xff] %v339_v57  ;;  %v242_v5 = vsel %vm164_vm0, %v801_v34, 0.0  ;;  %v182_v6 = vsel %vm164_vm0, %v795_v30, 0.0  ;;  %v319_v50 = vsel %vm164_vm0, %v288_v27, 0.0 }
  0x58   :  { %v243_v17 = vadd.f32 %v242_v5, %v241_v44  ;;  %v184_v34 = vsel %vm164_vm0, %v797_v31, 0.0  ;;  %v246_v30 = vsel %vm164_vm0, %v806_v37, 0.0  ;;  %v321_v53 = vsel %vm164_vm0, %v289_v28, 0.0 }
  0x59   :  { %v316_v15 = vadd.f32 %v840_v10, %v314_v42  ;;  %v186_v10 = vsel %vm164_vm0, %v799_v32, 0.0  ;;  %v323_v36 = vsel %vm164_vm0, %v290_v33, 0.0  ;;  %v183_v57 = vadd.f32 %v182_v6, %v181_v51 }
  0x5a   :  { %v245_v58 = vadd.f32 %v244_v49, %v243_v17  ;;  %v325_v1 = vsel %vm164_vm0, %v291_v35, 0.0  ;;  %v250_v31 = vsel %vm164_vm0, %v822_v55, 0.0  ;;  %v414_v27 = vperm.slane %v887_v24, 0 }
  0x5b   :  { %v318_v52 = vadd.f32 %v843_v11, %v316_v15  ;;  %v248_v11 = vsel %vm164_vm0, %v808_v38, 0.0  ;;  %v185_v2 = vadd.f32 %v184_v34, %v183_v57  ;;  %v431_v28 = vsel %vm430_vm2, %v427_v9, %v429_v13 }
  0x5c   :  { %v247_v7 = vadd.f32 %v246_v30, %v245_v58  ;;  %v424_v33 = vrot.slane %v415_v43, 6  ;;  %v380_v42 = vsel %vm164_vm0, %v866_v61, 0.0  ;;  %v254_v24 = vsel %vm164_vm0, %v827_v59, 0.0 }
  0x5d   :  { %v320_v63 = vadd.f32 %v319_v50, %v318_v52  ;;  %v187_v21 = vadd.f32 %v186_v10, %v185_v2  ;;  %v441_v45 = vmul.f32 %v431_v28, %v765_v0  ;;  %v384_v43 = vsel %vm164_vm0, %v874_v18, 0.0  ;;  %v454_v2 = vld.sshfl [vmem:[#allocation1 + $0x20] sm:$0xff pattern:$0x73625140] }
  0x5e   :  { %v348_v32 = vld.sshfl [vmem:[#allocation1] sm:$0xff pattern:$0x73625140]  ;;  %v349_v3 = vld.sshfl [vmem:[#allocation1 + $0x8] sm:$0xff pattern:$0x73625140]  ;;  %v249_v26 = vadd.f32 %v248_v11, %v247_v7  ;;  %v435_v59 = vsel %vm164_vm0, %v414_v27, %v424_v33  ;;  %v436_v0 = vsel %vm428_vm1, %v425_v41, %v426_v40 }
  0x5f   :  { %v322_v37 = vadd.f32 %v321_v53, %v320_v63  ;;  %v350_v16 = vld.sshfl [vmem:[#allocation1 + $0x10] sm:$0xff pattern:$0x73625140]  ;;  %v351_v19 = vld.sshfl [vmem:[#allocation1 + $0x18] sm:$0xff pattern:$0x73625140]  ;;  %188 = vadd.xlane.f32.xlu0 %v187_v21  ;;  %v437_v18 = vsel %vm430_vm2, %v435_v59, %v436_v0 }
  0x60   :  { %356 = vst [vmem:[#allocation1] ss:$4 sm:$0xff] %v341_v39  ;;  %v373_v54 = vsel %vm164_vm0, %v348_v32, 0.0  ;;  %v374_v38 = vsel %vm164_vm0, %v349_v3, 0.0  ;;  %v376_v25 = vsel %vm164_vm0, %v350_v16, 0.0  ;;  %v378_v20 = vsel %vm164_vm0, %v351_v19, 0.0 }
  0x61   :  { %v324_v55 = vadd.f32 %v323_v36, %v322_v37  ;;  %v375_v22 = vadd.f32 %v374_v38, %v373_v54  ;;  %v251_v39 = vadd.f32 %v250_v31, %v249_v26  ;;  %v256_v14 = vsel %vm164_vm0, %v829_v60, 0.0  ;;  %v455_v37 = vld.sshfl [vmem:[#allocation1 + $0x28] sm:$0xff pattern:$0x73625140] }
  0x62   :  { %v691_v29 = vmov 0.0   ;;  %v443_v17 = vmul.f32 %v437_v18, %v771_v8  ;;  %v482_v13 = vsel %vm164_vm0, %v454_v2, 0.0  ;;  %v456_v16 = vld.sshfl [vmem:[#allocation1 + $0x30] sm:$0xff pattern:$0x73625140]  ;;  %v484_v21 = vsel %vm164_vm0, %v455_v37, 0.0 }
  0x63   :  { %v326_v23 = vadd.f32 %v325_v1, %v324_v55  ;;  %v377_v35 = vadd.f32 %v376_v25, %v375_v22  ;;  %v253_v47 = vadd.f32 %v252_v4, %v251_v39  ;;  %117 = vst.msk [vmem:[%s1027_s8] sm:$0x3] %vm114_vm3, %v691_v29  ;;  %v457_v54 = vld.sshfl [vmem:[#allocation1 + $0x38] sm:$0xff pattern:$0x73625140]  ;;  %v486_v25 = vsel %vm164_vm0, %v456_v16, 0.0 }
  0x64   :  { %115 = vst.msk [vmem:[%s1025_s6] sm:$0x3] %vm114_vm3, %v691_v29  ;;  %v488_v26 = vsel %vm164_vm0, %v457_v54, 0.0 }
  0x65   :  { %327 = vadd.xlane.f32.xlu1 %v326_v23  ;;  %v379_v46 = vadd.f32 %v378_v20, %v377_v35  ;;  %v255_v15 = vadd.f32 %v254_v24, %v253_v47  ;;  %116 = vst.msk [vmem:[%s1026_s7] sm:$0x3] %vm114_vm3, %v691_v29 }
  0x66   :  { %118 = vst.msk [vmem:[%s1028_s9] sm:$0x3] %vm114_vm3, %v691_v29 }
  0x67   :  { %v357_v44 = vld.sshfl [vmem:[#allocation1] sm:$0xff pattern:$0x73625140]  ;;  %v358_v5 = vld.sshfl [vmem:[#allocation1 + $0x8] sm:$0xff pattern:$0x73625140]  ;;  %v381_v61 = vadd.f32 %v380_v42, %v379_v46  ;;  %v257_v50 = vadd.f32 %v256_v14, %v255_v15 }
  0x68   :  { %v359_v48 = vld.sshfl [vmem:[#allocation1 + $0x10] sm:$0xff pattern:$0x73625140]  ;;  %v360_v6 = vld.sshfl [vmem:[#allocation1 + $0x18] sm:$0xff pattern:$0x73625140] }
  0x69   :  { %v383_v49 = vadd.f32 %v382_v56, %v381_v61  ;;  %447 = vst [vmem:[#allocation1] ss:$4 sm:$0xff] %v441_v45  ;;  %v388_v51 = vsel %vm164_vm0, %v357_v44, 0.0  ;;  %258 = vadd.xlane.f32.xlu0 %v257_v50  ;;  %v390_v52 = vsel %vm164_vm0, %v358_v5, 0.0  ;;  %v392_v10 = vsel %vm164_vm0, %v359_v48, 0.0 }
  0x6a   :  { %119 = vst.msk [vmem:[%s1029_s10] sm:$0x3] %vm114_vm3, %v691_v29  ;;  %v394_v58 = vsel %vm164_vm0, %v360_v6, 0.0  ;;  %v269_v14 = vld [vmem:[%s1027_s8] sm:$0x3] }
  0x6b   :  { %v385_v60 = vadd.f32 %v384_v43, %v383_v49  ;;  %v129_v47 = vld [vmem:[%s1025_s6] sm:$0x3] }
  0x6c   :  { %v200_v59 = vld [vmem:[%s1026_s7] sm:$0x3] }
  0x6d   :  { %v387_v12 = vadd.f32 %v386_v62, %v385_v60  ;;  %v338_v49 = vld [vmem:[%s1028_s9] sm:$0x3] }
  0x6f   :  { %v389_v34 = vadd.f32 %v388_v51, %v387_v12 }
  0x70   :  { %v450_v30 = vld.sshfl [vmem:[#allocation1] sm:$0xff pattern:$0x73625140]  ;;  %v451_v53 = vld.sshfl [vmem:[#allocation1 + $0x8] sm:$0xff pattern:$0x73625140] }
  0x71   :  { %v391_v36 = vadd.f32 %v390_v52, %v389_v34  ;;  %v452_v57 = vld.sshfl [vmem:[#allocation1 + $0x10] sm:$0xff pattern:$0x73625140]  ;;  %v453_v8 = vld.sshfl [vmem:[#allocation1 + $0x18] sm:$0xff pattern:$0x73625140] }
  0x72   :  { %458 = vst [vmem:[#allocation1] ss:$4 sm:$0xff] %v443_v17  ;;  %v475_v63 = vsel %vm164_vm0, %v450_v30, 0.0  ;;  %v476_v1 = vsel %vm164_vm0, %v451_v53, 0.0  ;;  %v478_v11 = vsel %vm164_vm0, %v452_v57, 0.0  ;;  %v480_v3 = vsel %vm164_vm0, %v453_v8, 0.0 }
  0x73   :  { %v393_v31 = vadd.f32 %v392_v10, %v391_v36  ;;  %v477_v32 = vadd.f32 %v476_v1, %v475_v63  ;;  %v403_v18 = vld [vmem:[%s1029_s10] sm:$0x3] }
  0x75   :  { %v395_v7 = vadd.f32 %v394_v58, %v393_v31  ;;  %v479_v9 = vadd.f32 %v478_v11, %v477_v32 }
  0x77   :  { %396 = vadd.xlane.f32.xlu1 %v395_v7  ;;  %v481_v19 = vadd.f32 %v480_v3, %v479_v9 }
  0x79   :  { %v483_v38 = vadd.f32 %v482_v13, %v481_v19  ;;  %v459_v55 = vld.sshfl [vmem:[#allocation1] sm:$0xff pattern:$0x73625140]  ;;  %v460_v27 = vld.sshfl [vmem:[#allocation1 + $0x8] sm:$0xff pattern:$0x73625140] }
  0x7a   :  { %v490_v20 = vsel %vm164_vm0, %v459_v55, 0.0  ;;  %v461_v4 = vld.sshfl [vmem:[#allocation1 + $0x10] sm:$0xff pattern:$0x73625140]  ;;  %v492_v33 = vsel %vm164_vm0, %v460_v27, 0.0 }
  0x7b   :  { %v485_v22 = vadd.f32 %v484_v21, %v483_v38  ;;  %v462_v35 = vld.sshfl [vmem:[#allocation1 + $0x18] sm:$0xff pattern:$0x73625140]  ;;  %v494_v41 = vsel %vm164_vm0, %v461_v4, 0.0 }
  0x7c   :  { %v496_v42 = vsel %vm164_vm0, %v462_v35, 0.0 }
  0x7d   :  { %v487_v28 = vadd.f32 %v486_v25, %v485_v22 }
  0x7f   :  { %v489_v23 = vadd.f32 %v488_v26, %v487_v28 }
  0x81   :  { %v491_v39 = vadd.f32 %v490_v20, %v489_v23 }
  0x83   :  { %v493_v40 = vadd.f32 %v492_v33, %v491_v39 }
  0x85   :  { %v495_v24 = vadd.f32 %v494_v41, %v493_v40 }
  0x87   :  { %v497_v45 = vadd.f32 %v496_v42, %v495_v24 }
  0x89   :  { %498 = vadd.xlane.f32.xlu2 %v497_v45 }
  0xd2   :  { %v189_v46 = vpop.xlane.xlu0 %188 }
  0xd3   :  { %v190_v56 = vmul.f32 12.5, %v189_v46 }
  0xd5   :  { %v191_v44 = vadd.f32 %v190_v56, %v129_v47 }
  0xd7   :  { %193 = vst.msk [vmem:[%s1025_s6] sm:$0x3] %vm114_vm3, %v191_v44 }
  0xd8   :  { %v328_v43 = vpop.xlane.xlu1 %327 }
  0xd9   :  { %v329_v5 = vmul.f32 0.0006510417, %v328_v43 }
  0xdb   :  { %v330_v61 = vadd.f32 %v329_v5, %v269_v14 }
  0xdc   :  { %v259_v15 = vpop.xlane.xlu0 %258 }
  0xdd   :  { %331 = vst.msk [vmem:[%s1027_s8] sm:$0x3] %vm114_vm3, %v330_v61  ;;  %v260_v0 = vmul.f32 12.5, %v259_v15 }
  0xdf   :  { %v261_v48 = vadd.f32 %v260_v0, %v200_v59 }
  0xe1   :  { %262 = vst.msk [vmem:[%s1026_s7] sm:$0x3] %vm114_vm3, %v261_v48 }
  0xea   :  { %v397_v6 = vpop.xlane.xlu1 %396 }
  0xeb   :  { %v398_v62 = vmul.f32 0.0006510417, %v397_v6 }
  0xed   :  { %v399_v50 = vadd.f32 %v398_v62, %v338_v49 }
  0xef   :  { %400 = vst.msk [vmem:[%s1028_s9] sm:$0x3] %vm114_vm3, %v399_v50 }
  0xfc   :  { %v499_v60 = vpop.xlane.xlu2 %498 }
  0xfd   :  { %v500_v29 = vadd.f32 %v499_v60, %v403_v18 }
  0xff   :  { %501 = vst.msk [vmem:[%s1029_s10] sm:$0x3] %vm114_vm3, %v500_v29 }
 0x100   :  { %522 = vsyncpa [#allocation3], 1 }
 0x101   :  { %523 = vsyncpa [#allocation5], 1 }
 0x102   :  { %524 = vsyncpa [#allocation8], 1 }
 0x103   :  { %525 = vsyncpa [#allocation11], 1 }

</bundles_post_ra>
